<compile_context>
chip_gen: v6e
topology: v6e:2x2x1
jax: 0.10.0
libtpu: 0.0.40
codegen_flags: <defaults>
</compile_context>

<pallas_src>
import functools

import jax
import jax.numpy as jnp
from jax.experimental import pallas as pl
from jax.experimental.pallas import tpu as pltpu

# -----------------------------------------------------------------------------
# Model configuration (same 8-field cnf rows as the PyTorch module):
#   [repeats, kernel, stride, expand_ratio, input_c, out_c, op(0=Fused,1=MB), se_ratio]
# -----------------------------------------------------------------------------
MODEL_CNF = [
    [1, 3, 1, 1, 16, 16, 0, 0.0],    # FusedMBConv, no expansion, shortcut
    [1, 3, 2, 4, 16, 32, 0, 0.0],    # FusedMBConv, expansion, stride 2
    [1, 3, 2, 4, 32, 48, 1, 0.25],   # MBConv + SE, stride 2
    [1, 3, 1, 4, 48, 48, 1, 0.25],   # MBConv + SE, shortcut
]
NUM_CLASSES = 10
NUM_FEATURES = 128


def _round_up(v, m):
    return (v + m - 1) // m * m


def _vmem_capacity_bytes():
    try:
        return int(pltpu.get_tpu_info().vmem_capacity_bytes)
    except Exception:
        return 64 * 1024 * 1024          # conservative (v7x per-TC) fallback


_VMEM_CAP = _vmem_capacity_bytes()
if _VMEM_CAP >= 100 * 1024 * 1024:       # v5e / v6e: 128 MiB physical VMEM
    _TM_CAP = 1024
    _VMEM_LIMIT_BYTES = 64 * 1024 * 1024
else:                                     # v7x: 64 MiB per TensorCore
    _TM_CAP = 512
    _VMEM_LIMIT_BYTES = 48 * 1024 * 1024


def _mosaic_params(n_grid_dims=1):
    # "parallel" lets v7x shard the grid across its 2 TensorCores; harmless on v5e/v6e.
    return pltpu.CompilerParams(
        dimension_semantics=("parallel",) * n_grid_dims,
        vmem_limit_bytes=_VMEM_LIMIT_BYTES,
    )


# -----------------------------------------------------------------------------
# Phase decomposition: make every conv tap a contiguous in-kernel slice.
#   phase[(pi,pj)][n, a, b, c] = xp[n, s*a+pi, s*b+pj, c]
#   tap (di,dj) at output (ho,wo)  ->  phase[(di%s,dj%s)][ho+di//s, wo+dj//s]
# -----------------------------------------------------------------------------
def _phase_decompose(xp, k, stride, Ho, Wo):
    N, _, _, C = xp.shape
    s = stride
    Eh = Ho + (k - 1) // s
    Ew = Wo + (k - 1) // s
    phases = []
    for pi in range(s):
        for pj in range(s):
            ph = xp[:, pi::s, pj::s, :][:, :Eh, :Ew, :]
            ph = jnp.pad(ph, ((0, 0), (0, Eh - ph.shape[1]),
                              (0, Ew - ph.shape[2]), (0, 0)))
            phases.append(ph)
    P = s * s
    xin = jnp.stack(phases, axis=1).reshape(N * P, Eh, Ew, C)
    return xin, P, Eh, Ew


# -----------------------------------------------------------------------------
# Fused matmul + BN + activation (+ residual) kernel  (MXU path, 1x1 convs)
# -----------------------------------------------------------------------------
def _matmul_bn_act_kernel(*refs, act, has_res):
    if has_res:
        x_ref, w_ref, s_ref, b_ref, r_ref, o_ref = refs
    else:
        x_ref, w_ref, s_ref, b_ref, o_ref = refs
        r_ref = None
    y = jnp.dot(x_ref[...], w_ref[...], preferred_element_type=jnp.float32)
    y = y * s_ref[...] + b_ref[...]
    if act == "silu":
        y = y * jax.nn.sigmoid(y)
    if r_ref is not None:
        y = y + r_ref[...].astype(jnp.float32)
    o_ref[...] = y.astype(o_ref.dtype)


def fused_matmul_bn_act(x, w, scale, bias, act="silu", residual=None):
    """x:(M,K) @ w:(K,N) with folded-BN scale/bias; bf16 in/out, f32 accum/epilogue."""
    M, K = x.shape
    N = w.shape[1]

    x = x.astype(jnp.bfloat16)
    w = w.astype(jnp.bfloat16)

    Kp = _round_up(K, 16)
    if Kp != K:
        x = jnp.pad(x, ((0, 0), (0, Kp - K)))
        w = jnp.pad(w, ((0, Kp - K), (0, 0)))

    TM = min(_TM_CAP, _round_up(M, 8))
    Mp = _round_up(M, TM)
    if Mp != M:
        x = jnp.pad(x, ((0, Mp - M), (0, 0)))

    has_res = residual is not None
    args = [x, w,
            scale.reshape(1, N).astype(jnp.float32),
            bias.reshape(1, N).astype(jnp.float32)]
    in_specs = [
        pl.BlockSpec((TM, Kp), lambda i: (i, 0)),
        pl.BlockSpec((Kp, N), lambda i: (0, 0)),
        pl.BlockSpec((1, N), lambda i: (0, 0)),
        pl.BlockSpec((1, N), lambda i: (0, 0)),
    ]
    if has_res:
        r = residual.astype(jnp.bfloat16)
        if Mp != M:
            r = jnp.pad(r, ((0, Mp - M), (0, 0)))
        args.append(r)
        in_specs.append(pl.BlockSpec((TM, N), lambda i: (i, 0)))

    n_steps = Mp // TM
    cost = pl.CostEstimate(
        flops=2 * Mp * Kp * N,
        transcendentals=Mp * N if act == "silu" else 0,
        bytes_accessed=2 * (Mp * Kp + n_steps * Kp * N + Mp * N)
        + (2 * Mp * N if has_res else 0),
    )

    kernel = functools.partial(_matmul_bn_act_kernel, act=act, has_res=has_res)
    out = pl.pallas_call(
        kernel,
        out_shape=jax.ShapeDtypeStruct((Mp, N), jnp.bfloat16),
        grid=(n_steps,),
        in_specs=in_specs,
        out_specs=pl.BlockSpec((TM, N), lambda i: (i, 0)),
        compiler_params=_mosaic_params(1),
        cost_estimate=cost,
    )(*args)
    return out[:M] if Mp != M else out


# -----------------------------------------------------------------------------
# Implicit-GEMM 3x3 conv + BN + activation (+ residual): no HBM im2col.
# One grid step per batch element; k*k MXU dots on in-VMEM shifted taps.
# -----------------------------------------------------------------------------
def _conv3x3_kernel(*refs, k, stride, act, has_res, Ho, Wo):
    if has_res:
        x_ref, w_ref, sc_ref, bi_ref, r_ref, o_ref = refs
    else:
        x_ref, w_ref, sc_ref, bi_ref, o_ref = refs
        r_ref = None
    cin = x_ref.shape[-1]
    cout = o_ref.shape[-1]
    acc = jnp.zeros((Ho * Wo, cout), jnp.float32)
    for di in range(k):
        for dj in range(k):
            p = (di % stride) * stride + (dj % stride)
            oi, oj = di // stride, dj // stride
            tap = x_ref[p, oi:oi + Ho, oj:oj + Wo, :]            # bf16 (Ho, Wo, cin)
            acc = acc + jnp.dot(tap.reshape(Ho * Wo, cin),
                                w_ref[di * k + dj],
                                preferred_element_type=jnp.float32)
    y = acc * sc_ref[...] + bi_ref[...]
    if act == "silu":
        y = y * jax.nn.sigmoid(y)
    if r_ref is not None:
        y = y + r_ref[0].astype(jnp.float32)
    o_ref[0] = y.astype(o_ref.dtype)


def conv3x3_bn_act(x, w_oihw, bn_scale, bn_bias, stride, act="silu", residual=None):
    out_c, in_c, k, _ = w_oihw.shape
    N, H, W, _ = x.shape
    pad = (k - 1) // 2

    xb = x.astype(jnp.bfloat16)
    Cp = _round_up(in_c, 8)                 # tiny lane pad for the stem's Cin=3
    if Cp != in_c:
        xb = jnp.pad(xb, ((0, 0), (0, 0), (0, 0), (0, Cp - in_c)))
    xp = jnp.pad(xb, ((0, 0), (pad, pad), (pad, pad), (0, 0)))
    Hp, Wp = H + 2 * pad, W + 2 * pad
    Ho = (Hp - k) // stride + 1
    Wo = (Wp - k) // stride + 1
    xin, P, Eh, Ew = _phase_decompose(xp, k, stride, Ho, Wo)

    wt = jnp.transpose(w_oihw, (2, 3, 1, 0)).reshape(k * k, in_c, out_c)
    if Cp != in_c:
        wt = jnp.pad(wt, ((0, 0), (0, Cp - in_c), (0, 0)))
    wt = wt.astype(jnp.bfloat16)

    Npix = Ho * Wo
    args = [xin, wt,
            bn_scale.reshape(1, out_c).astype(jnp.float32),
            bn_bias.reshape(1, out_c).astype(jnp.float32)]
    in_specs = [
        pl.BlockSpec((P, Eh, Ew, Cp), lambda n: (n, 0, 0, 0)),
        pl.BlockSpec((k * k, Cp, out_c), lambda n: (0, 0, 0)),
        pl.BlockSpec((1, out_c), lambda n: (0, 0)),
        pl.BlockSpec((1, out_c), lambda n: (0, 0)),
    ]
    has_res = residual is not None
    if has_res:
        args.append(residual.astype(jnp.bfloat16).reshape(N, Npix, out_c))
        in_specs.append(pl.BlockSpec((1, Npix, out_c), lambda n: (n, 0, 0)))

    cost = pl.CostEstimate(
        flops=2 * N * Npix * k * k * Cp * out_c,
        transcendentals=N * Npix * out_c if act == "silu" else 0,
        bytes_accessed=2 * (N * P * Eh * Ew * Cp + k * k * Cp * out_c + N * Npix * out_c),
    )
    kernel = functools.partial(_conv3x3_kernel, k=k, stride=stride, act=act,
                               has_res=has_res, Ho=Ho, Wo=Wo)
    out = pl.pallas_call(
        kernel,
        out_shape=jax.ShapeDtypeStruct((N, Npix, out_c), jnp.bfloat16),
        grid=(N,),
        in_specs=in_specs,
        out_specs=pl.BlockSpec((1, Npix, out_c), lambda n: (n, 0, 0)),
        compiler_params=_mosaic_params(1),
        cost_estimate=cost,
    )(*args)
    return out.reshape(N, Ho, Wo, out_c)


# -----------------------------------------------------------------------------
# Fused depthwise conv + BN + SiLU (VPU path, vectorized taps for both strides)
# -----------------------------------------------------------------------------
def _dwconv_bn_silu_kernel(x_ref, w_ref, s_ref, b_ref, o_ref, *, k, stride):
    _, Ho, Wo, C = o_ref.shape
    w = w_ref[...]                               # (k*k, C) f32
    scale = s_ref[...]                           # (1, C)  f32
    bias = b_ref[...]
    x_all = x_ref[...].astype(jnp.float32)       # cast hoisted: (P, Eh, Ew, C)
    acc = jnp.zeros((Ho, Wo, C), jnp.float32)
    for dj in range(k):
        oj = dj // stride
        # One sublane-shifted slab per dj (hoisted out of the di loop).
        xw = x_all[:, :, oj:oj + Wo, :]          # (P, Eh, Wo, C)
        for di in range(k):
            p = (di % stride) * stride + (dj % stride)
            oi = di // stride
            tap = xw[p, oi:oi + Ho, :, :]        # (Ho, Wo, C)
            t = di * k + dj
            acc = acc + tap * w[t:t + 1, :]
    y = acc * scale + bias
    o_ref[0] = (y * jax.nn.sigmoid(y)).astype(o_ref.dtype)


def dwconv_bn_silu(x, w_dw, bn_scale, bn_bias, stride):
    N, H, W, C = x.shape
    k = w_dw.shape[2]
    pad = (k - 1) // 2
    xp = jnp.pad(x.astype(jnp.bfloat16), ((0, 0), (pad, pad), (pad, pad), (0, 0)))
    Hp, Wp = H + 2 * pad, W + 2 * pad
    Ho = (Hp - k) // stride + 1
    Wo = (Wp - k) // stride + 1
    xin, P, Eh, Ew = _phase_decompose(xp, k, stride, Ho, Wo)
    wm = jnp.transpose(w_dw[:, 0], (1, 2, 0)).reshape(k * k, C).astype(jnp.float32)

    # NOTE: for very large resolutions (v7x, 64 MiB VMEM) the H axis could be
    # tiled as a second grid dimension with halos; unnecessary at these sizes.
    kernel = functools.partial(_dwconv_bn_silu_kernel, k=k, stride=stride)
    return pl.pallas_call(
        kernel,
        out_shape=jax.ShapeDtypeStruct((N, Ho, Wo, C), jnp.bfloat16),
        grid=(N,),
        in_specs=[
            pl.BlockSpec((P, Eh, Ew, C), lambda n: (n, 0, 0, 0)),
            pl.BlockSpec((k * k, C), lambda n: (0, 0)),
            pl.BlockSpec((1, C), lambda n: (0, 0)),
            pl.BlockSpec((1, C), lambda n: (0, 0)),
        ],
        out_specs=pl.BlockSpec((1, Ho, Wo, C), lambda n: (n, 0, 0, 0)),
        compiler_params=_mosaic_params(1),
    )(xin, wm,
      bn_scale.reshape(1, C).astype(jnp.float32),
      bn_bias.reshape(1, C).astype(jnp.float32))


# -----------------------------------------------------------------------------
# SqueezeExcite fused with the 1x1 project conv (+BN, optional residual).
# One grid step per batch element; the expanded tensor is read exactly once.
# -----------------------------------------------------------------------------
def _se_project_kernel(*refs, has_res):
    if has_res:
        x_ref, w1_ref, b1_ref, w2_ref, b2_ref, wp_ref, sc_ref, bi_ref, r_ref, o_ref = refs
    else:
        x_ref, w1_ref, b1_ref, w2_ref, b2_ref, wp_ref, sc_ref, bi_ref, o_ref = refs
        r_ref = None
    x = x_ref[0]                                           # (HW, Cexp) bf16
    xf = x.astype(jnp.float32)
    m = jnp.mean(xf, axis=0, keepdims=True)                # (1, Cexp) global pool
    g = jnp.dot(m, w1_ref[...], preferred_element_type=jnp.float32) + b1_ref[...]
    g = g * jax.nn.sigmoid(g)                              # SiLU
    g = jnp.dot(g, w2_ref[...], preferred_element_type=jnp.float32) + b2_ref[...]
    g = jax.nn.sigmoid(g)                                  # (1, Cexp) gates
    xg = (xf * g).astype(jnp.bfloat16)                     # channel rescale
    y = jnp.dot(xg, wp_ref[...], preferred_element_type=jnp.float32)
    y = y * sc_ref[...] + bi_ref[...]
    if r_ref is not None:
        y = y + r_ref[0].astype(jnp.float32)
    o_ref[0] = y.astype(o_ref.dtype)


def se_project(x_nhwc, w1, b1, w2, b2, wp_oihw, bn_scale, bn_bias, residual=None):
    N, H, W, Cexp = x_nhwc.shape
    Cout = wp_oihw.shape[0]
    Csq = w1.shape[1]
    HW = H * W
    x3 = x_nhwc.astype(jnp.bfloat16).reshape(N, HW, Cexp)
    wp = wp_oihw.reshape(Cout, Cexp).T.astype(jnp.bfloat16)

    args = [x3, w1, b1.reshape(1, Csq), w2, b2.reshape(1, Cexp), wp,
            bn_scale.reshape(1, Cout).astype(jnp.float32),
            bn_bias.reshape(1, Cout).astype(jnp.float32)]
    in_specs = [
        pl.BlockSpec((1, HW, Cexp), lambda n: (n, 0, 0)),
        pl.BlockSpec((Cexp, Csq), lambda n: (0, 0)),
        pl.BlockSpec((1, Csq), lambda n: (0, 0)),
        pl.BlockSpec((Csq, Cexp), lambda n: (0, 0)),
        pl.BlockSpec((1, Cexp), lambda n: (0, 0)),
        pl.BlockSpec((Cexp, Cout), lambda n: (0, 0)),
        pl.BlockSpec((1, Cout), lambda n: (0, 0)),
        pl.BlockSpec((1, Cout), lambda n: (0, 0)),
    ]
    has_res = residual is not None
    if has_res:
        args.append(residual.astype(jnp.bfloat16).reshape(N, HW, Cout))
        in_specs.append(pl.BlockSpec((1, HW, Cout), lambda n: (n, 0, 0)))

    out = pl.pallas_call(
        functools.partial(_se_project_kernel, has_res=has_res),
        out_shape=jax.ShapeDtypeStruct((N, HW, Cout), jnp.bfloat16),
        grid=(N,),
        in_specs=in_specs,
        out_specs=pl.BlockSpec((1, HW, Cout), lambda n: (n, 0, 0)),
        compiler_params=_mosaic_params(1),
    )(*args)
    return out.reshape(N, H, W, Cout)


# -----------------------------------------------------------------------------
# Fused global-average-pool + linear classifier
# -----------------------------------------------------------------------------
def _pool_fc_kernel(x_ref, w_ref, b_ref, o_ref):
    m = jnp.mean(x_ref[...].astype(jnp.float32), axis=1)          # (N, F)
    y = jnp.dot(m, w_ref[...], preferred_element_type=jnp.float32) + b_ref[...]
    o_ref[...] = y.astype(o_ref.dtype)


def avgpool_classifier(x_nhwc, w, b):
    N, H, W, F = x_nhwc.shape
    NC = w.shape[1]
    x3 = x_nhwc.reshape(N, H * W, F)
    return pl.pallas_call(
        _pool_fc_kernel,
        out_shape=jax.ShapeDtypeStruct((N, NC), jnp.float32),
        grid=(1,),
        in_specs=[
            pl.BlockSpec((N, H * W, F), lambda i: (0, 0, 0)),
            pl.BlockSpec((F, NC), lambda i: (0, 0)),
            pl.BlockSpec((1, NC), lambda i: (0, 0)),
        ],
        out_specs=pl.BlockSpec((N, NC), lambda i: (0, 0)),
        compiler_params=_mosaic_params(1),
    )(x3, w, b.reshape(1, NC))


# -----------------------------------------------------------------------------
# Conv dispatch: 1x1 -> tiled matmul path, 3x3 -> implicit-GEMM kernel
# -----------------------------------------------------------------------------
def conv_bn_act(x, w_oihw, bn_scale, bn_bias, stride, act="silu", residual_nhwc=None):
    out_c, in_c, k, _ = w_oihw.shape
    if k == 1 and stride == 1:
        N, H, W, C = x.shape
        xm = x.astype(jnp.bfloat16).reshape(N * H * W, C)
        wm = w_oihw.reshape(out_c, in_c).T
        res = residual_nhwc.reshape(-1, out_c) if residual_nhwc is not None else None
        y = fused_matmul_bn_act(xm, wm, bn_scale, bn_bias, act=act, residual=res)
        return y.reshape(N, H, W, out_c)
    return conv3x3_bn_act(x, w_oihw, bn_scale, bn_bias, stride, act=act,
                          residual=residual_nhwc)


# -----------------------------------------------------------------------------
# Parameter init (deterministic; kaiming-normal fan_out style for convs)
# -----------------------------------------------------------------------------
def _bn_fold(c, eps=1e-3):
    gamma = jnp.ones((c,), jnp.float32)
    beta = jnp.zeros((c,), jnp.float32)
    mean = jnp.zeros((c,), jnp.float32)
    var = jnp.ones((c,), jnp.float32)
    scale = gamma / jnp.sqrt(var + eps)
    return scale, beta - mean * scale


def init_params(key):
    keys = iter(jax.random.split(key, 128))

    def conv_p(out_c, in_c, k):
        fan_out = out_c * k * k
        std = (2.0 / fan_out) ** 0.5
        return std * jax.random.normal(next(keys), (out_c, in_c, k, k), jnp.float32)

    params = {}
    stem_c = MODEL_CNF[0][4]
    params["stem"] = dict(w=conv_p(stem_c, 3, 3), bn=_bn_fold(stem_c))

    blocks = []
    for cnf in MODEL_CNF:
        repeats, k, stride0, expand, in_c0, out_c, op, se_ratio = cnf
        for i in range(repeats):
            in_c = in_c0 if i == 0 else out_c
            stride = stride0 if i == 0 else 1
            expanded = in_c * expand
            b = dict(op=op, k=k, stride=stride, in_c=in_c, out_c=out_c,
                     expand=expand, se_ratio=se_ratio,
                     has_shortcut=(stride == 1 and in_c == out_c))
            if op == 0:  # FusedMBConv
                if expand != 1:
                    b["expand_w"] = conv_p(expanded, in_c, k)
                    b["expand_bn"] = _bn_fold(expanded)
                    b["project_w"] = conv_p(out_c, expanded, 1)
                    b["project_bn"] = _bn_fold(out_c)
                else:
                    b["project_w"] = conv_p(out_c, in_c, k)
                    b["project_bn"] = _bn_fold(out_c)
            else:  # MBConv
                b["expand_w"] = conv_p(expanded, in_c, 1)
                b["expand_bn"] = _bn_fold(expanded)
                b["dw_w"] = conv_p(expanded, 1, k)
                b["dw_bn"] = _bn_fold(expanded)
                if se_ratio > 0:
                    sq = int(in_c * se_ratio)
                    b["se_w1"] = conv_p(sq, expanded, 1).reshape(sq, expanded).T
                    b["se_b1"] = jnp.zeros((sq,), jnp.float32)
                    b["se_w2"] = conv_p(expanded, sq, 1).reshape(expanded, sq).T
                    b["se_b2"] = jnp.zeros((expanded,), jnp.float32)
                b["project_w"] = conv_p(out_c, expanded, 1)
                b["project_bn"] = _bn_fold(out_c)
            blocks.append(b)
    params["blocks"] = blocks

    head_in = MODEL_CNF[-1][-3]
    params["head_w"] = conv_p(NUM_FEATURES, head_in, 1)
    params["head_bn"] = _bn_fold(NUM_FEATURES)
    params["fc_w"] = 0.01 * jax.random.normal(next(keys), (NUM_FEATURES, NUM_CLASSES), jnp.float32)
    params["fc_b"] = jnp.zeros((NUM_CLASSES,), jnp.float32)
    return params


# -----------------------------------------------------------------------------
# Forward (eval mode: BN uses running stats; Dropout / DropPath are identity)
# -----------------------------------------------------------------------------
def forward(params, x_nchw):
    # layout: NCHW input (PyTorch) -> NHWC compute; bf16 activations end-to-end
    x = jnp.transpose(x_nchw, (0, 2, 3, 1)).astype(jnp.bfloat16)

    p = params["stem"]
    x = conv_bn_act(x, p["w"], p["bn"][0], p["bn"][1], stride=2, act="silu")

    for b in params["blocks"]:
        shortcut = x if b["has_shortcut"] else None
        if b["op"] == 0:  # FusedMBConv
            if b["expand"] != 1:
                h = conv_bn_act(x, b["expand_w"], *b["expand_bn"],
                                stride=b["stride"], act="silu")
                x = conv_bn_act(h, b["project_w"], *b["project_bn"],
                                stride=1, act="identity", residual_nhwc=shortcut)
            else:
                x = conv_bn_act(x, b["project_w"], *b["project_bn"],
                                stride=b["stride"], act="silu", residual_nhwc=shortcut)
        else:  # MBConv
            h = conv_bn_act(x, b["expand_w"], *b["expand_bn"], stride=1, act="silu")
            h = dwconv_bn_silu(h, b["dw_w"], *b["dw_bn"], stride=b["stride"])
            if b["se_ratio"] > 0:
                # SE + 1x1 project conv + BN (+ residual) fused in one kernel.
                x = se_project(h, b["se_w1"], b["se_b1"], b["se_w2"], b["se_b2"],
                               b["project_w"], *b["project_bn"], residual=shortcut)
            else:
                x = conv_bn_act(h, b["project_w"], *b["project_bn"],
                                stride=1, act="identity", residual_nhwc=shortcut)
        # TODO(synk): DropPath (stochastic depth) is training-only; identity in eval mode.

    # head: project_conv -> avgpool -> flatten -> (dropout: eval identity) -> classifier
    x = conv_bn_act(x, params["head_w"], *params["head_bn"], stride=1, act="silu")
    return avgpool_classifier(x, params["fc_w"], params["fc_b"])


if __name__ == "__main__":
    key = jax.random.PRNGKey(0)
    pkey, xkey = jax.random.split(key)
    params = init_params(pkey)

    x = jax.random.normal(xkey, (2, 3, 16, 16), jnp.float32)  # NCHW, like PyTorch
    out = forward(params, x)
    out = jax.block_until_ready(out)
    assert out.shape == (2, NUM_CLASSES), out.shape
    assert bool(jnp.all(jnp.isfinite(out)))
    print("KERNEL_OK")
</pallas_src>

<mosaic_0001>
module attributes {stable_mosaic.version = 11 : i64} {
  func.func @_conv3x3_kernel(%arg0: i32, %arg1: memref<4x9x9x8xbf16, #tpu.memory_space<vmem>>, %arg2: memref<9x8x16xbf16, #tpu.memory_space<vmem>>, %arg3: memref<1x16xf32, #tpu.memory_space<vmem>>, %arg4: memref<1x16xf32, #tpu.memory_space<vmem>>, %arg5: memref<1x64x16xbf16, #tpu.memory_space<vmem>>) attributes {dimension_semantics = [#tpu.dimension_semantics<parallel>], iteration_bounds = array<i64: 2>, scalar_prefetch = 0 : i64, scratch_operands = 0 : i64, tpu.core_type = #tpu.core_type<tc>, window_params = [{transform_indices = @transform_0, window_bounds = array<i64: 4, 9, 9, 8>}, {pipeline_mode = #tpu.pipeline_mode<synchronous>, transform_indices = @transform_1, window_bounds = array<i64: 9, 8, 16>}, {pipeline_mode = #tpu.pipeline_mode<synchronous>, transform_indices = @transform_2, window_bounds = array<i64: 1, 16>}, {pipeline_mode = #tpu.pipeline_mode<synchronous>, transform_indices = @transform_3, window_bounds = array<i64: 1, 16>}, {transform_indices = @transform_4, window_bounds = array<i64: 1, 64, 16>}]} {
    %cst = arith.constant 0.000000e+00 : f32
    %0 = vector.broadcast %cst : f32 to vector<64x16xf32>
    %c0 = arith.constant 0 : index
    %c0_0 = arith.constant 0 : index
    %c0_1 = arith.constant 0 : index
    %c0_2 = arith.constant 0 : index
    %1 = vector.load %arg1[%c0, %c0_0, %c0_1, %c0_2] : memref<4x9x9x8xbf16, #tpu.memory_space<vmem>>, vector<1x8x8x8xbf16>
    %2 = vector.shape_cast %1 : vector<1x8x8x8xbf16> to vector<8x8x8xbf16>
    %3 = vector.shape_cast %2 : vector<8x8x8xbf16> to vector<64x8xbf16>
    %c0_3 = arith.constant 0 : index
    %c0_4 = arith.constant 0 : index
    %c0_5 = arith.constant 0 : index
    %4 = vector.load %arg2[%c0_3, %c0_4, %c0_5] : memref<9x8x16xbf16, #tpu.memory_space<vmem>>, vector<1x8x16xbf16>
    %5 = vector.shape_cast %4 : vector<1x8x16xbf16> to vector<8x16xbf16>
    %cst_6 = arith.constant dense<0.000000e+00> : vector<64x16xf32>
    %6 = tpu.matmul %3, %5, %cst_6 {dimension_numbers = #tpu.dot_dimension_numbers<[1], [0], [0], [1], [0, 0, 1, 1], [], []>} : vector<64x8xbf16>, vector<8x16xbf16>, vector<64x16xf32> -> vector<64x16xf32>
    %7 = arith.addf %0, %6 : vector<64x16xf32>
    %c1 = arith.constant 1 : index
    %c0_7 = arith.constant 0 : index
    %c0_8 = arith.constant 0 : index
    %c0_9 = arith.constant 0 : index
    %8 = vector.load %arg1[%c1, %c0_7, %c0_8, %c0_9] : memref<4x9x9x8xbf16, #tpu.memory_space<vmem>>, vector<1x8x8x8xbf16>
    %9 = vector.shape_cast %8 : vector<1x8x8x8xbf16> to vector<8x8x8xbf16>
    %10 = vector.shape_cast %9 : vector<8x8x8xbf16> to vector<64x8xbf16>
    %c1_10 = arith.constant 1 : index
    %c0_11 = arith.constant 0 : index
    %c0_12 = arith.constant 0 : index
    %11 = vector.load %arg2[%c1_10, %c0_11, %c0_12] : memref<9x8x16xbf16, #tpu.memory_space<vmem>>, vector<1x8x16xbf16>
    %12 = vector.shape_cast %11 : vector<1x8x16xbf16> to vector<8x16xbf16>
    %cst_13 = arith.constant dense<0.000000e+00> : vector<64x16xf32>
    %13 = tpu.matmul %10, %12, %cst_13 {dimension_numbers = #tpu.dot_dimension_numbers<[1], [0], [0], [1], [0, 0, 1, 1], [], []>} : vector<64x8xbf16>, vector<8x16xbf16>, vector<64x16xf32> -> vector<64x16xf32>
    %14 = arith.addf %7, %13 : vector<64x16xf32>
    %c0_14 = arith.constant 0 : index
    %c0_15 = arith.constant 0 : index
    %c1_16 = arith.constant 1 : index
    %c0_17 = arith.constant 0 : index
    %15 = vector.load %arg1[%c0_14, %c0_15, %c1_16, %c0_17] : memref<4x9x9x8xbf16, #tpu.memory_space<vmem>>, vector<1x8x8x8xbf16>
    %16 = vector.shape_cast %15 : vector<1x8x8x8xbf16> to vector<8x8x8xbf16>
    %17 = vector.shape_cast %16 : vector<8x8x8xbf16> to vector<64x8xbf16>
    %c2 = arith.constant 2 : index
    %c0_18 = arith.constant 0 : index
    %c0_19 = arith.constant 0 : index
    %18 = vector.load %arg2[%c2, %c0_18, %c0_19] : memref<9x8x16xbf16, #tpu.memory_space<vmem>>, vector<1x8x16xbf16>
    %19 = vector.shape_cast %18 : vector<1x8x16xbf16> to vector<8x16xbf16>
    %cst_20 = arith.constant dense<0.000000e+00> : vector<64x16xf32>
    %20 = tpu.matmul %17, %19, %cst_20 {dimension_numbers = #tpu.dot_dimension_numbers<[1], [0], [0], [1], [0, 0, 1, 1], [], []>} : vector<64x8xbf16>, vector<8x16xbf16>, vector<64x16xf32> -> vector<64x16xf32>
    %21 = arith.addf %14, %20 : vector<64x16xf32>
    %c2_21 = arith.constant 2 : index
    %c0_22 = arith.constant 0 : index
    %c0_23 = arith.constant 0 : index
    %c0_24 = arith.constant 0 : index
    %22 = vector.load %arg1[%c2_21, %c0_22, %c0_23, %c0_24] : memref<4x9x9x8xbf16, #tpu.memory_space<vmem>>, vector<1x8x8x8xbf16>
    %23 = vector.shape_cast %22 : vector<1x8x8x8xbf16> to vector<8x8x8xbf16>
    %24 = vector.shape_cast %23 : vector<8x8x8xbf16> to vector<64x8xbf16>
    %c3 = arith.constant 3 : index
    %c0_25 = arith.constant 0 : index
    %c0_26 = arith.constant 0 : index
    %25 = vector.load %arg2[%c3, %c0_25, %c0_26] : memref<9x8x16xbf16, #tpu.memory_space<vmem>>, vector<1x8x16xbf16>
    %26 = vector.shape_cast %25 : vector<1x8x16xbf16> to vector<8x16xbf16>
    %cst_27 = arith.constant dense<0.000000e+00> : vector<64x16xf32>
    %27 = tpu.matmul %24, %26, %cst_27 {dimension_numbers = #tpu.dot_dimension_numbers<[1], [0], [0], [1], [0, 0, 1, 1], [], []>} : vector<64x8xbf16>, vector<8x16xbf16>, vector<64x16xf32> -> vector<64x16xf32>
    %28 = arith.addf %21, %27 : vector<64x16xf32>
    %c3_28 = arith.constant 3 : index
    %c0_29 = arith.constant 0 : index
    %c0_30 = arith.constant 0 : index
    %c0_31 = arith.constant 0 : index
    %29 = vector.load %arg1[%c3_28, %c0_29, %c0_30, %c0_31] : memref<4x9x9x8xbf16, #tpu.memory_space<vmem>>, vector<1x8x8x8xbf16>
    %30 = vector.shape_cast %29 : vector<1x8x8x8xbf16> to vector<8x8x8xbf16>
    %31 = vector.shape_cast %30 : vector<8x8x8xbf16> to vector<64x8xbf16>
    %c4 = arith.constant 4 : index
    %c0_32 = arith.constant 0 : index
    %c0_33 = arith.constant 0 : index
    %32 = vector.load %arg2[%c4, %c0_32, %c0_33] : memref<9x8x16xbf16, #tpu.memory_space<vmem>>, vector<1x8x16xbf16>
    %33 = vector.shape_cast %32 : vector<1x8x16xbf16> to vector<8x16xbf16>
    %cst_34 = arith.constant dense<0.000000e+00> : vector<64x16xf32>
    %34 = tpu.matmul %31, %33, %cst_34 {dimension_numbers = #tpu.dot_dimension_numbers<[1], [0], [0], [1], [0, 0, 1, 1], [], []>} : vector<64x8xbf16>, vector<8x16xbf16>, vector<64x16xf32> -> vector<64x16xf32>
    %35 = arith.addf %28, %34 : vector<64x16xf32>
    %c2_35 = arith.constant 2 : index
    %c0_36 = arith.constant 0 : index
    %c1_37 = arith.constant 1 : index
    %c0_38 = arith.constant 0 : index
    %36 = vector.load %arg1[%c2_35, %c0_36, %c1_37, %c0_38] : memref<4x9x9x8xbf16, #tpu.memory_space<vmem>>, vector<1x8x8x8xbf16>
    %37 = vector.shape_cast %36 : vector<1x8x8x8xbf16> to vector<8x8x8xbf16>
    %38 = vector.shape_cast %37 : vector<8x8x8xbf16> to vector<64x8xbf16>
    %c5 = arith.constant 5 : index
    %c0_39 = arith.constant 0 : index
    %c0_40 = arith.constant 0 : index
    %39 = vector.load %arg2[%c5, %c0_39, %c0_40] : memref<9x8x16xbf16, #tpu.memory_space<vmem>>, vector<1x8x16xbf16>
    %40 = vector.shape_cast %39 : vector<1x8x16xbf16> to vector<8x16xbf16>
    %cst_41 = arith.constant dense<0.000000e+00> : vector<64x16xf32>
    %41 = tpu.matmul %38, %40, %cst_41 {dimension_numbers = #tpu.dot_dimension_numbers<[1], [0], [0], [1], [0, 0, 1, 1], [], []>} : vector<64x8xbf16>, vector<8x16xbf16>, vector<64x16xf32> -> vector<64x16xf32>
    %42 = arith.addf %35, %41 : vector<64x16xf32>
    %c0_42 = arith.constant 0 : index
    %c1_43 = arith.constant 1 : index
    %c0_44 = arith.constant 0 : index
    %c0_45 = arith.constant 0 : index
    %43 = vector.load %arg1[%c0_42, %c1_43, %c0_44, %c0_45] : memref<4x9x9x8xbf16, #tpu.memory_space<vmem>>, vector<1x8x8x8xbf16>
    %44 = vector.shape_cast %43 : vector<1x8x8x8xbf16> to vector<8x8x8xbf16>
    %45 = vector.shape_cast %44 : vector<8x8x8xbf16> to vector<64x8xbf16>
    %c6 = arith.constant 6 : index
    %c0_46 = arith.constant 0 : index
    %c0_47 = arith.constant 0 : index
    %46 = vector.load %arg2[%c6, %c0_46, %c0_47] : memref<9x8x16xbf16, #tpu.memory_space<vmem>>, vector<1x8x16xbf16>
    %47 = vector.shape_cast %46 : vector<1x8x16xbf16> to vector<8x16xbf16>
    %cst_48 = arith.constant dense<0.000000e+00> : vector<64x16xf32>
    %48 = tpu.matmul %45, %47, %cst_48 {dimension_numbers = #tpu.dot_dimension_numbers<[1], [0], [0], [1], [0, 0, 1, 1], [], []>} : vector<64x8xbf16>, vector<8x16xbf16>, vector<64x16xf32> -> vector<64x16xf32>
    %49 = arith.addf %42, %48 : vector<64x16xf32>
    %c1_49 = arith.constant 1 : index
    %c1_50 = arith.constant 1 : index
    %c0_51 = arith.constant 0 : index
    %c0_52 = arith.constant 0 : index
    %50 = vector.load %arg1[%c1_49, %c1_50, %c0_51, %c0_52] : memref<4x9x9x8xbf16, #tpu.memory_space<vmem>>, vector<1x8x8x8xbf16>
    %51 = vector.shape_cast %50 : vector<1x8x8x8xbf16> to vector<8x8x8xbf16>
    %52 = vector.shape_cast %51 : vector<8x8x8xbf16> to vector<64x8xbf16>
    %c7 = arith.constant 7 : index
    %c0_53 = arith.constant 0 : index
    %c0_54 = arith.constant 0 : index
    %53 = vector.load %arg2[%c7, %c0_53, %c0_54] : memref<9x8x16xbf16, #tpu.memory_space<vmem>>, vector<1x8x16xbf16>
    %54 = vector.shape_cast %53 : vector<1x8x16xbf16> to vector<8x16xbf16>
    %cst_55 = arith.constant dense<0.000000e+00> : vector<64x16xf32>
    %55 = tpu.matmul %52, %54, %cst_55 {dimension_numbers = #tpu.dot_dimension_numbers<[1], [0], [0], [1], [0, 0, 1, 1], [], []>} : vector<64x8xbf16>, vector<8x16xbf16>, vector<64x16xf32> -> vector<64x16xf32>
    %56 = arith.addf %49, %55 : vector<64x16xf32>
    %c0_56 = arith.constant 0 : index
    %c1_57 = arith.constant 1 : index
    %c1_58 = arith.constant 1 : index
    %c0_59 = arith.constant 0 : index
    %57 = vector.load %arg1[%c0_56, %c1_57, %c1_58, %c0_59] : memref<4x9x9x8xbf16, #tpu.memory_space<vmem>>, vector<1x8x8x8xbf16>
    %58 = vector.shape_cast %57 : vector<1x8x8x8xbf16> to vector<8x8x8xbf16>
    %59 = vector.shape_cast %58 : vector<8x8x8xbf16> to vector<64x8xbf16>
    %c8 = arith.constant 8 : index
    %c0_60 = arith.constant 0 : index
    %c0_61 = arith.constant 0 : index
    %60 = vector.load %arg2[%c8, %c0_60, %c0_61] : memref<9x8x16xbf16, #tpu.memory_space<vmem>>, vector<1x8x16xbf16>
    %61 = vector.shape_cast %60 : vector<1x8x16xbf16> to vector<8x16xbf16>
    %cst_62 = arith.constant dense<0.000000e+00> : vector<64x16xf32>
    %62 = tpu.matmul %59, %61, %cst_62 {dimension_numbers = #tpu.dot_dimension_numbers<[1], [0], [0], [1], [0, 0, 1, 1], [], []>} : vector<64x8xbf16>, vector<8x16xbf16>, vector<64x16xf32> -> vector<64x16xf32>
    %63 = arith.addf %56, %62 : vector<64x16xf32>
    %c0_63 = arith.constant 0 : index
    %c0_64 = arith.constant 0 : index
    %64 = vector.load %arg3[%c0_63, %c0_64] : memref<1x16xf32, #tpu.memory_space<vmem>>, vector<1x16xf32>
    %65 = vector.broadcast %64 : vector<1x16xf32> to vector<64x16xf32>
    %66 = arith.mulf %63, %65 : vector<64x16xf32>
    %c0_65 = arith.constant 0 : index
    %c0_66 = arith.constant 0 : index
    %67 = vector.load %arg4[%c0_65, %c0_66] : memref<1x16xf32, #tpu.memory_space<vmem>>, vector<1x16xf32>
    %68 = vector.broadcast %67 : vector<1x16xf32> to vector<64x16xf32>
    %69 = arith.addf %66, %68 : vector<64x16xf32>
    %70 = arith.negf %69 : vector<64x16xf32>
    %71 = math.exp %70 : vector<64x16xf32>
    %cst_67 = arith.constant 1.000000e+00 : f32
    %72 = vector.broadcast %cst_67 : f32 to vector<64x16xf32>
    %73 = arith.addf %72, %71 : vector<64x16xf32>
    %74 = arith.divf %72, %73 : vector<64x16xf32>
    %75 = arith.mulf %69, %74 : vector<64x16xf32>
    %76 = arith.truncf %75 : vector<64x16xf32> to vector<64x16xbf16>
    %c0_68 = arith.constant 0 : index
    %c0_69 = arith.constant 0 : index
    %c0_70 = arith.constant 0 : index
    %77 = vector.load %arg5[%c0_68, %c0_69, %c0_70] : memref<1x64x16xbf16, #tpu.memory_space<vmem>>, vector<1x64x16xbf16>
    %78 = vector.shape_cast %77 : vector<1x64x16xbf16> to vector<64x16xbf16>
    %79 = vector.shape_cast %76 : vector<64x16xbf16> to vector<1x64x16xbf16>
    tpu.vector_store %arg5[%c0_68, %c0_69, %c0_70], %79 {strides = array<i32>} : memref<1x64x16xbf16, #tpu.memory_space<vmem>>, vector<1x64x16xbf16>,
    return
  }
  func.func @transform_0(%arg0: i32) -> (i32, i32, i32, i32) {
    %c0_i32 = arith.constant 0 : i32
    %c0_i32_0 = arith.constant 0 : i32
    %c0_i32_1 = arith.constant 0 : i32
    %c0_i32_2 = arith.constant 0 : i32
    return %arg0, %c0_i32, %c0_i32_0, %c0_i32_1 : i32, i32, i32, i32
  }
  func.func @transform_1(%arg0: i32) -> (i32, i32, i32) {
    %c0_i32 = arith.constant 0 : i32
    %c0_i32_0 = arith.constant 0 : i32
    %c0_i32_1 = arith.constant 0 : i32
    %c0_i32_2 = arith.constant 0 : i32
    return %c0_i32, %c0_i32_0, %c0_i32_1 : i32, i32, i32
  }
  func.func @transform_2(%arg0: i32) -> (i32, i32) {
    %c0_i32 = arith.constant 0 : i32
    %c0_i32_0 = arith.constant 0 : i32
    %c0_i32_1 = arith.constant 0 : i32
    return %c0_i32, %c0_i32_0 : i32, i32
  }
  func.func @transform_3(%arg0: i32) -> (i32, i32) {
    %c0_i32 = arith.constant 0 : i32
    %c0_i32_0 = arith.constant 0 : i32
    %c0_i32_1 = arith.constant 0 : i32
    return %c0_i32, %c0_i32_0 : i32, i32
  }
  func.func @transform_4(%arg0: i32) -> (i32, i32, i32) {
    %c0_i32 = arith.constant 0 : i32
    %c0_i32_0 = arith.constant 0 : i32
    %c0_i32_1 = arith.constant 0 : i32
    return %arg0, %c0_i32, %c0_i32_0 : i32, i32, i32
  }
}

</mosaic_0001>

<bundles_post_ra>
// kernel: tpu_custom_call.1
= control target key start
LH: loop header
LB: loop body
LE: loop exit
PB: predicated region body
PF: predicated region fallthrough
CT: control target
= control target key end

     0   :  { %s2212_s15 = smov 0   ;;  %s2524_s0 = inlined_call_operand.vmem [shape: bf16[8,9,9,8], index: 0, kind: input, shape index: {}]   ;;  %s2525_s1 = inlined_call_operand.vmem [shape: bf16[9,8,16], index: 1, kind: input, shape index: {}]   ;;  %s2526_s2 = inlined_call_operand.vmem [shape: f32[1,16], index: 2, kind: input, shape index: {}]   ;;  %s2527_s3 = inlined_call_operand.vmem [shape: f32[1,16], index: 3, kind: input, shape index: {}]   ;;  %s2528_s4 = inlined_call_operand.vmem [shape: bf16[2,64,16], index: 4, kind: output, shape index: {}]  }
   0x1 LB: > { %s2218_s16 = sadd.s32 4294967295, %s2185_s15   ;;  %p1781_p0 = scmp.ge.s32.totalorder %s2185_s15, 1  ;;  %s2185_s15 = sphi %s2212_s15, %s14_s15  }
   0x2   : > { %p164_p1 = scmp.lt.s32.totalorder %s2185_s15, 3 }
   0x4   : > { %p165_p2 = pnand %p1781_p0, %p164_p1 }
   0x5   : > { %s1782_s19 = sshll.u32 (!%p165_p2), %s2218_s16, 2  ;;  %p198_p4 = scmp.lt.s32.totalorder (!%p165_p2), %s2218_s16, 1 }
   0x6   : > { %168 = sbr.rel (%p165_p2) target bundleno = 337 (0x151), region = 36  ;;  %p192_p3 = scmp.lt.s32.totalorder (!%p165_p2), %s1782_s19, 7 }
   0xb   : > { %v1794_v0 = vld [vmem:[%s2525_s1 + $0x4] sm:$0xf]  ;;  %vm257_vm0 = vcmask 1043456   ;;  %v212_v2 = vld [vmem:[%s2525_s1] sm:$0xf]  ;;  %s2532_s19 = smov (!%p192_p3, %s1782_s19), 7 }
   0xc   : > { %2105 = vmatprep.subr.msk.bf16.mxu1 %vm257_vm0, %v1794_v0  ;;  %2104 = vmatprep.subr.msk.bf16.mxu0 %vm257_vm0, %v1794_v0  ;;  %v259_v1 = vsel %vm257_vm0, %v1794_v0, 0  ;;  %v1811_v3 = vld [vmem:[%s2525_s1 + $0x8] sm:$0xf]  ;;  %s2114_s24 = smul.u32 72, %s2532_s19  ;;  %vm244_vm1 = vcmask 64512   ;;  %v359_v4 = vsel %vm257_vm0, %v212_v2, 0 }
   0xd   : > { %2103 = vmatpush3.bf16.msra.mxu1 %v259_v1  ;;  %2013 = vmatpush3.bf16.msra.mxu0 %v259_v1  ;;  %v584_v5 = vsel %vm257_vm0, %v1811_v3, 0  ;;  %v1828_v7 = vld [vmem:[%s2525_s1 + $0xc] sm:$0xf]  ;;  %v1845_v8 = vld [vmem:[%s2525_s1 + $0x10] sm:$0xf]  ;;  %s2534_s16 = smov (!%p198_p4, %s2218_s16), 1 }
   0xe   : > { %2106 = vmatprep.subr.msk.bf16.mxu1 %vm257_vm0, %v212_v2  ;;  %2107 = vmatprep.subr.msk.bf16.mxu0 %vm257_vm0, %v1811_v3  ;;  %s2240_s27 = scalar_lea.vmem %s2524_s0, %s2114_s24  ;;  %vm442_vm2 = vsmask.f32 3328  ;;  %vm443_vm3 = vsmask.f32 7440  ;;  %v703_v13 = vsel %vm257_vm0, %v1828_v7, 0  ;;  %v2261_v14 = vsel %vm257_vm0, %v1845_v8, 0 }
   0xf   : > { %v2123_v6 = vld [vmem:[%s2240_s27 + $0x48] ss:$8 sps:$4 sm:$0xff]   ;;  %v2125_v10 = vld [vmem:[%s2240_s27 + $0x58] ss:$8 sps:$4 sm:$0xff]   ;;  %v427_v16 = vld [vmem:[%s2240_s27 + $0x4] sm:$0x1] }
  0x10   : > { %v2124_v9 = vld [vmem:[%s2240_s27 + $0x68] ss:$8 sps:$4 sm:$0xff]   ;;  %2014 = vmatprep.mubr.msk.bf16.mxu0 %vm244_vm1, %v2123_v6  ;;  %v2126_v11 = vld [vmem:[%s2240_s27 + $0x78] ss:$8 sps:$4 sm:$0xff]   ;;  %v429_v19 = vld [vmem:[%s2240_s27 + $0xc] sm:$0x1] }
  0x11   : > { %2018 = vmatprep.mubr.msk.bf16.mxu1 %vm244_vm1, %v2124_v9  ;;  %2015 = vmatmul.mubr.msk.bf16.vlgmr.msra.gmra.mxu0 %vm244_vm1, %v2125_v10  ;;  %v2127_v12 = vld [vmem:[%s2240_s27] ss:$8 sps:$4 sm:$0xff]   ;;  %v2128_v18 = vld [vmem:[%s2240_s27 + $0x10] ss:$8 sps:$4 sm:$0xff]   ;;  %v455_v22 = vshll.u32 %v427_v16, 16  ;;  %v469_v25 = vshll.u32 %v429_v19, 16  ;;  %vm2282_vm4 = vmor %vm442_vm2, %vm443_vm3 }
  0x12   : > { %2019 = vmatmul.mubr.msk.bf16.vlgmr.msra.gmra.mxu1 %vm244_vm1, %v2126_v11  ;;  %2033 = vmatpush3.bf16.msra.mxu0 %v584_v5  ;;  %v426_v15 = vld [vmem:[%s2240_s27] sm:$0xf]  ;;  %v428_v17 = vld [vmem:[%s2240_s27 + $0x8] sm:$0xf]  ;;  %v430_v26 = vld [vmem:[%s2240_s27 + $0x10] sm:$0xf] }
  0x13   : > { %2023 = vmatpush3.bf16.msra.mxu1 %v359_v4  ;;  %2024 = vmatprep.mubr.msk.bf16.mxu1 %vm244_vm1, %v2127_v12  ;;  %v446_v20 = vshrl.u32 %v426_v15, 16  ;;  %v449_v21 = vshll.u32 %v426_v15, 16  ;;  %v460_v23 = vshrl.u32 %v428_v17, 16  ;;  %v463_v24 = vshll.u32 %v428_v17, 16  ;;  %v431_v27 = vld [vmem:[%s2240_s27 + $0x14] sm:$0x1] }
  0x14   : > { %2108 = vmatprep.subr.msk.bf16.mxu1 %vm257_vm0, %v1828_v7  ;;  %2109 = vmatprep.subr.msk.bf16.mxu0 %vm257_vm0, %v1845_v8  ;;  %v457_v30 = vrot.slane %v455_v22, 5  ;;  %v432_v32 = vld [vmem:[%s2240_s27 + $0x18] sm:$0xf]  ;;  %v471_v34 = vrot.slane %v469_v25, 5  ;;  %v433_v35 = vld [vmem:[%s2240_s27 + $0x1c] sm:$0x1] }
  0x15   : > { %v448_v28 = vrot.slane %v446_v20, 4  ;;  %v451_v29 = vrot.slane %v449_v21, 5  ;;  %v462_v31 = vrot.slane %v460_v23, 4  ;;  %v465_v33 = vrot.slane %v463_v24, 5  ;;  %v2278_v38 = vld [vmem:[%s2525_s1 + $0x14] sm:$0xf] }
  0x16   : > { %v474_v36 = vshrl.u32 %v430_v26, 16  ;;  %v477_v37 = vshll.u32 %v430_v26, 16  ;;  %v483_v40 = vshll.u32 %v431_v27, 16  ;;  %v488_v41 = vshrl.u32 %v432_v32, 16  ;;  %v2129_v52 = vld [vmem:[%s2240_s27 + $0x20] ss:$8 sps:$4 sm:$0xff]  }
  0x17   : > { %v452_v39 = vor.u32 %v451_v29, %v448_v28  ;;  %v491_v42 = vshll.u32 %v432_v32, 16  ;;  %v466_v44 = vor.u32 %v465_v33, %v462_v31  ;;  %v497_v47 = vshll.u32 %v433_v35, 16  ;;  %v2130_v58 = vld [vmem:[%s2240_s27 + $0x30] ss:$8 sps:$4 sm:$0xff]   ;;  %v434_v59 = vld [vmem:[%s2240_s27 + $0x20] sm:$0xf] }
  0x18   : > { %v476_v45 = vrot.slane %v474_v36, 4  ;;  %v479_v46 = vrot.slane %v477_v37, 5  ;;  %v485_v49 = vrot.slane %v483_v40, 5  ;;  %v490_v50 = vrot.slane %v488_v41, 4  ;;  %v435_v60 = vld [vmem:[%s2240_s27 + $0x24] sm:$0x1] }
  0x19   : > { %v453_v48 = vrot.slane %v452_v39, 4  ;;  %v493_v51 = vrot.slane %v491_v42, 5  ;;  %v467_v53 = vrot.slane %v466_v44, 4  ;;  %v499_v55 = vrot.slane %v497_v47, 5  ;;  %v436_v63 = vld [vmem:[%s2240_s27 + $0x28] sm:$0xf] }
  0x1a   : > { %2025 = vmatmul.mubr.msk.bf16.vlgmr.msra.gmra.mxu1 %vm244_vm1, %v2128_v18  ;;  %v480_v54 = vor.u32 %v479_v46, %v476_v45  ;;  %v437_v0 = vld [vmem:[%s2240_s27 + $0x2c] sm:$0x1]  ;;  %v502_v1 = vshrl.u32 %v434_v59, 16  ;;  %v505_v4 = vshll.u32 %v434_v59, 16  ;;  %v511_v5 = vshll.u32 %v435_v60, 16  ;;  %s1958_s20 = sshll.u32 %s2534_s16, 5 }
  0x1b   : > { %2043 = vmatpush3.bf16.msra.mxu1 %v703_v13  ;;  %v458_v56 = vsel %vm2282_vm4, %v453_v48, %v457_v30  ;;  %v494_v57 = vor.u32 %v493_v51, %v490_v50  ;;  %2028 = vmatprep.mubr.msk.bf16.mxu1 %vm244_vm1, %v2129_v52  ;;  %v472_v61 = vsel %vm2282_vm4, %v467_v53, %v471_v34  ;;  %v438_v6 = vld [vmem:[%s2240_s27 + $0x30] sm:$0xf]  ;;  %v516_v9 = vshrl.u32 %v436_v63, 16  ;;  %v439_v11 = vld [vmem:[%s2240_s27 + $0x34] sm:$0x1]  ;;  %s2499_s23 = scalar_lea.vmem %s2528_s4, %s1958_s20 }
  0x1c   : > { %2110 = vmatprep.subr.msk.bf16.mxu1 %vm257_vm0, %v2278_v38  ;;  %v481_v62 = vrot.slane %v480_v54, 4  ;;  %v1812_v2 = vcombine.low %v458_v56, %v472_v61  ;;  %v504_v8 = vrot.slane %v502_v1, 4  ;;  %v519_v10 = vshll.u32 %v436_v63, 16  ;;  %v440_v17 = vld [vmem:[%s2240_s27 + $0x38] sm:$0xf] }
  0x1d   : > { %v495_v3 = vrot.slane %v494_v57, 4  ;;  %v507_v13 = vrot.slane %v505_v4, 5  ;;  %v513_v15 = vrot.slane %v511_v5, 5  ;;  %v525_v16 = vshll.u32 %v437_v0, 16  ;;  %v1887_v18 = vld [vmem:[%s2525_s1 + $0x18] sm:$0xf] }
  0x1e   : > { %v486_v7 = vsel %vm2282_vm4, %v481_v62, %v485_v49  ;;  %2034 = vmatprep.mubr.msk.bf16.mxu0 %vm244_vm1, %v1812_v2  ;;  %v518_v20 = vrot.slane %v516_v9, 4  ;;  %v521_v21 = vrot.slane %v519_v10, 5  ;;  %v441_v22 = vld [vmem:[%s2240_s27 + $0x3c] sm:$0x1]  ;;  %v530_v23 = vshrl.u32 %v438_v6, 16 }
  0x1f   : > { %v500_v12 = vsel %vm2282_vm4, %v495_v3, %v499_v55  ;;  %v508_v24 = vor.u32 %v507_v13, %v504_v8  ;;  %v527_v25 = vrot.slane %v525_v16, 5  ;;  %v533_v26 = vshll.u32 %v438_v6, 16  ;;  %v2131_v35 = vld [vmem:[%s2240_s27 + $0x90] ss:$8 sps:$4 sm:$0xff]   ;;  %v2132_v44 = vld [vmem:[%s2240_s27 + $0xa0] ss:$8 sps:$4 sm:$0xff]  }
  0x20   : > { %v1813_v19 = vcombine.low %v486_v7, %v500_v12  ;;  %v539_v27 = vshll.u32 %v439_v11, 16  ;;  %v522_v28 = vor.u32 %v521_v21, %v518_v20  ;;  %v532_v29 = vrot.slane %v530_v23, 4  ;;  %v1904_v51 = vld [vmem:[%s2525_s1 + $0x1c] sm:$0xf]  ;;  %v2135_v53 = vld [vmem:[%s2240_s27 + $0xb0] ss:$8 sps:$4 sm:$0xff]  }
  0x21   : > { %v544_v30 = vshrl.u32 %v440_v17, 16  ;;  %v547_v31 = vshll.u32 %v440_v17, 16  ;;  %v509_v32 = vrot.slane %v508_v24, 4  ;;  %v535_v33 = vrot.slane %v533_v26, 5  ;;  %v2136_v57 = vld [vmem:[%s2240_s27 + $0xc0] ss:$8 sps:$4 sm:$0xff]  }
  0x22   : > { %2029 = vmatmul.mubr.msk.bf16.gmra.mxu1 %vm244_vm1, %v2130_v58  ;;  %2035 = vmatmul.mubr.msk.bf16.vlgmr.msra.gmra.mxu0 %vm244_vm1, %v1813_v19  ;;  %v553_v34 = vshll.u32 %v441_v22, 16  ;;  %v523_v36 = vrot.slane %v522_v28, 4  ;;  %v541_v42 = vrot.slane %v539_v27, 5  ;;  %v1052_v49 = vsel %vm257_vm0, %v2278_v38, 0  ;;  %v2133_v38 = vld [vmem:[%s2240_s27 + $0xd8] ss:$8 sps:$4 sm:$0xff]  }
  0x23   : > { %2053 = vmatpush3.bf16.msra.mxu0 %v2261_v14  ;;  %v546_v37 = vrot.slane %v544_v30, 4  ;;  %v549_v39 = vrot.slane %v547_v31, 5  ;;  %v514_v40 = vsel %vm2282_vm4, %v509_v32, %v513_v15  ;;  %v536_v41 = vor.u32 %v535_v33, %v532_v29  ;;  %2044 = vmatprep.mubr.msk.bf16.mxu1 %vm244_vm1, %v2131_v35  ;;  %v1854_v58 = vld [vmem:[%s2240_s27 + $0x90] sm:$0xf]  ;;  %v1855_v59 = vld [vmem:[%s2240_s27 + $0x94] sm:$0x1] }
  0x24   : > { %2111 = vmatprep.subr.msk.bf16.mxu0 %vm257_vm0, %v1887_v18  ;;  %v528_v14 = vsel %vm2282_vm4, %v523_v36, %v527_v25  ;;  %v555_v46 = vrot.slane %v553_v34, 5  ;;  %v1171_v56 = vsel %vm257_vm0, %v1887_v18, 0  ;;  %v1856_v60 = vld [vmem:[%s2240_s27 + $0x98] sm:$0xf]  ;;  %v1857_v61 = vld [vmem:[%s2240_s27 + $0x9c] sm:$0x1] }
  0x25   : > { %v550_v45 = vor.u32 %v549_v39, %v546_v37  ;;  %v1814_v47 = vcombine.low %v514_v40, %v528_v14  ;;  %v537_v48 = vrot.slane %v536_v41, 4  ;;  %v914_v62 = vshrl.u32 %v1854_v58, 16  ;;  %v1858_v2 = vld [vmem:[%s2240_s27 + $0xa0] sm:$0xf]  ;;  %v2134_v3 = vld [vmem:[%s2240_s27 + $0xe8] ss:$8 sps:$4 sm:$0xff]  }
  0x26   : > { %v917_v63 = vshll.u32 %v1854_v58, 16  ;;  %v923_v0 = vshll.u32 %v1855_v59, 16  ;;  %v928_v1 = vshrl.u32 %v1856_v60, 16  ;;  %v931_v4 = vshll.u32 %v1856_v60, 16  ;;  %v1859_v6 = vld [vmem:[%s2240_s27 + $0xa4] sm:$0x1] }
  0x27   : > { %v551_v50 = vrot.slane %v550_v45, 4  ;;  %2038 = vmatprep.mubr.msk.bf16.mxu0 %vm244_vm1, %v1814_v47  ;;  %v542_v52 = vsel %vm2282_vm4, %v537_v48, %v541_v42  ;;  %v937_v5 = vshll.u32 %v1857_v61, 16  ;;  %v1860_v7 = vld [vmem:[%s2240_s27 + $0xa8] sm:$0xf]  ;;  %v2137_v8 = vld [vmem:[%s2240_s27 + $0xf8] ss:$8 sps:$4 sm:$0xff]  }
  0x28   : > { %v916_v9 = vrot.slane %v914_v62, 4  ;;  %v919_v10 = vrot.slane %v917_v63, 5  ;;  %v925_v11 = vrot.slane %v923_v0, 5  ;;  %v930_v12 = vrot.slane %v928_v1, 4  ;;  %v1861_v13 = vld [vmem:[%s2240_s27 + $0xac] sm:$0x1] }
  0x29   : > { %v556_v54 = vsel %vm2282_vm4, %v551_v50, %v555_v46  ;;  %v933_v15 = vrot.slane %v931_v4, 5  ;;  %v939_v16 = vrot.slane %v937_v5, 5  ;;  %v942_v17 = vshrl.u32 %v1858_v2, 16  ;;  %v2356_v27 = vld [vmem:[%s2525_s1 + $0x20] sm:$0xf] }
  0x2a   : > { %2045 = vmatmul.mubr.msk.bf16.vlgmr.msra.gmra.mxu1 %vm244_vm1, %v2132_v44  ;;  %v1815_v55 = vcombine.low %v542_v52, %v556_v54  ;;  %v945_v18 = vshll.u32 %v1858_v2, 16  ;;  %v920_v19 = vor.u32 %v919_v10, %v916_v9  ;;  %v951_v20 = vshll.u32 %v1859_v6, 16  ;;  %v1862_v39 = vld [vmem:[%s2240_s27 + $0xb0] sm:$0xf]  ;;  %v1863_v40 = vld [vmem:[%s2240_s27 + $0xb4] sm:$0x1] }
  0x2b   : > { %2063 = vmatpush3.bf16.msra.mxu1 %v1052_v49  ;;  %2048 = vmatprep.mubr.msk.bf16.mxu1 %vm244_vm1, %v2135_v53  ;;  %v956_v21 = vshrl.u32 %v1860_v7, 16  ;;  %v959_v22 = vshll.u32 %v1860_v7, 16  ;;  %v934_v23 = vor.u32 %v933_v15, %v930_v12  ;;  %v944_v24 = vrot.slane %v942_v17, 4  ;;  %v1864_v41 = vld [vmem:[%s2240_s27 + $0xb8] sm:$0xf] }
  0x2c   : > { %2112 = vmatprep.subr.msk.bf16.mxu1 %vm257_vm0, %v1904_v51  ;;  %2039 = vmatmul.mubr.msk.bf16.gmra.mxu0 %vm244_vm1, %v1815_v55  ;;  %v947_v25 = vrot.slane %v945_v18, 5  ;;  %v965_v26 = vshll.u32 %v1861_v13, 16  ;;  %v921_v28 = vrot.slane %v920_v19, 4  ;;  %v1290_v31 = vsel %vm257_vm0, %v1904_v51, 0  ;;  %v2138_v42 = vld [vmem:[%s2240_s27 + $0x108] ss:$8 sps:$4 sm:$0xff]  }
  0x2d   : > { %2054 = vmatprep.mubr.msk.bf16.mxu0 %vm244_vm1, %v2133_v38  ;;  %v958_v29 = vrot.slane %v956_v21, 4  ;;  %v961_v30 = vrot.slane %v959_v22, 5  ;;  %v935_v32 = vrot.slane %v934_v23, 4  ;;  %v953_v34 = vrot.slane %v951_v20, 5  ;;  %v1865_v45 = vld [vmem:[%s2240_s27 + $0xbc] sm:$0x1] }
  0x2e   : > { %v948_v33 = vor.u32 %v947_v25, %v944_v24  ;;  %v967_v35 = vrot.slane %v965_v26, 5  ;;  %v926_v36 = vsel %vm2282_vm4, %v921_v28, %v925_v11  ;;  %v970_v46 = vshrl.u32 %v1862_v39, 16  ;;  %v2139_v50 = vld [vmem:[%s2240_s27 + $0x8] ss:$8 sps:$4 sm:$0xff]   ;;  %v1866_v53 = vld [vmem:[%s2240_s27 + $0xc0] sm:$0xf] }
  0x2f   : > { %v962_v37 = vor.u32 %v961_v30, %v958_v29  ;;  %v940_v44 = vsel %vm2282_vm4, %v935_v32, %v939_v16  ;;  %v973_v47 = vshll.u32 %v1862_v39, 16  ;;  %v979_v51 = vshll.u32 %v1863_v40, 16  ;;  %v1868_v62 = vld [vmem:[%s2240_s27 + $0xc8] sm:$0xf]  ;;  %v1869_v2 = vld [vmem:[%s2240_s27 + $0xcc] sm:$0x1] }
  0x30   : > { %v949_v14 = vrot.slane %v948_v33, 4  ;;  %v1871_v48 = vcombine.low %v926_v36, %v940_v44  ;;  %v984_v52 = vshrl.u32 %v1864_v41, 16  ;;  %v972_v38 = vrot.slane %v970_v46, 4  ;;  %v2140_v16 = vld [vmem:[%s2240_s27 + $0x18] ss:$8 sps:$4 sm:$0xff]  }
  0x31   : > { %v963_v49 = vrot.slane %v962_v37, 4  ;;  %v975_v55 = vrot.slane %v973_v47, 5  ;;  %v981_v59 = vrot.slane %v979_v51, 5  ;;  %v993_v61 = vshll.u32 %v1865_v45, 16  ;;  %v2141_v29 = vld [vmem:[%s2240_s27 + $0x28] ss:$8 sps:$4 sm:$0xff]  }
  0x32   : > { %2049 = vmatmul.mubr.msk.bf16.gmra.mxu1 %vm244_vm1, %v2136_v57  ;;  %v954_v54 = vsel %vm2282_vm4, %v949_v14, %v953_v34  ;;  %v1867_v57 = vld [vmem:[%s2240_s27 + $0xc4] sm:$0x1]  ;;  %v986_v60 = vrot.slane %v984_v52, 4  ;;  %v1001_v5 = vshll.u32 %v1866_v53, 16  ;;  %v1012_v7 = vshrl.u32 %v1868_v62, 16 }
  0x33   : > { %2064 = vmatprep.mubr.msk.bf16.mxu1 %vm244_vm1, %v1871_v48  ;;  %v968_v58 = vsel %vm2282_vm4, %v963_v49, %v967_v35  ;;  %v976_v0 = vor.u32 %v975_v55, %v972_v38  ;;  %v995_v4 = vrot.slane %v993_v61, 5  ;;  %v1007_v6 = vshll.u32 %v1867_v57, 16  ;;  %v1913_v30 = vld [vmem:[%s2240_s27 + $0x8] sm:$0xf]  ;;  %v2143_v32 = vld [vmem:[%s2240_s27 + $0x50] ss:$8 sps:$4 sm:$0xff]  }
  0x34   : > { %2055 = vmatmul.mubr.msk.bf16.vlgmr.msra.gmra.mxu0 %vm244_vm1, %v2134_v3  ;;  %v1872_v63 = vcombine.low %v954_v54, %v968_v58  ;;  %v998_v3 = vshrl.u32 %v1866_v53, 16  ;;  %v1015_v11 = vshll.u32 %v1868_v62, 16  ;;  %v1003_v12 = vrot.slane %v1001_v5, 5  ;;  %v1914_v33 = vld [vmem:[%s2240_s27 + $0xc] sm:$0x1] }
  0x35   : > { %2073 = vmatpush3.bf16.msra.mxu0 %v1171_v56  ;;  %2058 = vmatprep.mubr.msk.bf16.mxu0 %vm244_vm1, %v2137_v8  ;;  %v987_v56 = vshll.u32 %v1864_v41, 16  ;;  %v977_v8 = vrot.slane %v976_v0, 4  ;;  %v1014_v13 = vrot.slane %v1012_v7, 4  ;;  %v1021_v15 = vshll.u32 %v1869_v2, 16  ;;  %v1915_v34 = vld [vmem:[%s2240_s27 + $0x10] sm:$0xf] }
  0x36   : > { %2113 = vmatprep.subr.msk.bf16.mxu0 %vm257_vm0, %v2356_v27  ;;  %v1000_v10 = vrot.slane %v998_v3, 4  ;;  %v1017_v19 = vrot.slane %v1015_v11, 5  ;;  %v1009_v21 = vrot.slane %v1007_v6, 5  ;;  %v1520_v25 = vsel %vm257_vm0, %v2356_v27, 0  ;;  %v1916_v37 = vld [vmem:[%s2240_s27 + $0x14] sm:$0x1] }
  0x37   : > { %v989_v1 = vrot.slane %v987_v56, 5  ;;  %v982_v17 = vsel %vm2282_vm4, %v977_v8, %v981_v59  ;;  %v1023_v24 = vrot.slane %v1021_v15, 5  ;;  %v1382_v35 = vshrl.u32 %v1913_v30, 16  ;;  %v1917_v45 = vld [vmem:[%s2240_s27 + $0x18] sm:$0xf] }
  0x38   : > { %v1004_v20 = vor.u32 %v1003_v12, %v1000_v10  ;;  %v1018_v23 = vor.u32 %v1017_v19, %v1014_v13  ;;  %v1385_v39 = vshll.u32 %v1913_v30, 16  ;;  %v1391_v27 = vshll.u32 %v1914_v33, 16  ;;  %v2142_v51 = vld [vmem:[%s2240_s27 + $0x38] ss:$8 sps:$4 sm:$0xff]   ;;  %v1920_v38 = vld [vmem:[%s2240_s27 + $0x24] sm:$0x1] }
  0x39   : > { %v990_v9 = vor.u32 %v989_v1, %v986_v60  ;;  %v1396_v40 = vshrl.u32 %v1915_v34, 16  ;;  %v1399_v44 = vshll.u32 %v1915_v34, 16  ;;  %v1405_v14 = vshll.u32 %v1916_v37, 16  ;;  %v1919_v54 = vld [vmem:[%s2240_s27 + $0x20] sm:$0xf] }
  0x3a   : > { %2065 = vmatmul.mubr.msk.bf16.vlgmr.msra.gmra.mxu1 %vm244_vm1, %v1872_v63  ;;  %v1005_v28 = vrot.slane %v1004_v20, 4  ;;  %v1387_v47 = vrot.slane %v1385_v39, 5  ;;  %v1393_v48 = vrot.slane %v1391_v27, 5  ;;  %v1410_v56 = vshrl.u32 %v1917_v45, 16  ;;  %v2144_v63 = vld [vmem:[%s2240_s27 + $0x60] ss:$8 sps:$4 sm:$0xff]  }
  0x3b   : > { %2083 = vmatpush3.bf16.msra.mxu1 %v1290_v31  ;;  %v991_v18 = vrot.slane %v990_v9, 4  ;;  %v1019_v31 = vrot.slane %v1018_v23, 4  ;;  %v1398_v49 = vrot.slane %v1396_v40, 4  ;;  %v1401_v52 = vrot.slane %v1399_v44, 5  ;;  %v2145_v6 = vld [vmem:[%s2240_s27 + $0x70] ss:$8 sps:$4 sm:$0xff]  }
  0x3c   : > { %2059 = vmatmul.mubr.msk.bf16.gmra.mxu0 %vm244_vm1, %v2138_v42  ;;  %v1010_v36 = vsel %vm2282_vm4, %v1005_v28, %v1009_v21  ;;  %v1384_v42 = vrot.slane %v1382_v35, 4  ;;  %v1407_v53 = vrot.slane %v1405_v14, 5  ;;  %v1413_v57 = vshll.u32 %v1917_v45, 16  ;;  %v1921_v11 = vld [vmem:[%s2240_s27 + $0x28] sm:$0xf] }
  0x3d   : > { %2074 = vmatprep.mubr.msk.bf16.mxu0 %vm244_vm1, %v2139_v50  ;;  %v996_v22 = vsel %vm2282_vm4, %v991_v18, %v995_v4  ;;  %v1024_v41 = vsel %vm2282_vm4, %v1019_v31, %v1023_v24  ;;  %v1918_v50 = vld [vmem:[%s2240_s27 + $0x1c] sm:$0x1]  ;;  %v1402_v59 = vor.u32 %v1401_v52, %v1398_v49  ;;  %v1424_v60 = vshrl.u32 %v1919_v54, 16  ;;  %v1922_v15 = vld [vmem:[%s2240_s27 + $0x2c] sm:$0x1] }
  0x3e   : > { %v1873_v26 = vcombine.low %v982_v17, %v996_v22  ;;  %v1874_v46 = vcombine.low %v1010_v36, %v1024_v41  ;;  %v1388_v55 = vor.u32 %v1387_v47, %v1384_v42  ;;  %v1419_v58 = vshll.u32 %v1918_v50, 16  ;;  %v1924_v17 = vld [vmem:[%s2240_s27 + $0x34] sm:$0x1]  ;;  %v1925_v22 = vld [vmem:[%s2240_s27 + $0x38] sm:$0xf] }
  0x3f   : > { %v1427_v61 = vshll.u32 %v1919_v54, 16  ;;  %v1433_v62 = vshll.u32 %v1920_v38, 16  ;;  %v1412_v1 = vrot.slane %v1410_v56, 4  ;;  %v1415_v2 = vrot.slane %v1413_v57, 5  ;;  %v1926_v28 = vld [vmem:[%s2240_s27 + $0x3c] sm:$0x1] }
  0x40   : > { %2068 = vmatprep.mubr.msk.bf16.mxu1 %vm244_vm1, %v1873_v26  ;;  %v1389_v0 = vrot.slane %v1388_v55, 4  ;;  %v1403_v3 = vrot.slane %v1402_v59, 4  ;;  %v1426_v4 = vrot.slane %v1424_v60, 4  ;;  %v1421_v9 = vrot.slane %v1419_v58, 5  ;;  %v1927_v33 = vld [vmem:[%s2240_s27 + $0x40] sm:$0xf] }
  0x41   : > { %v1429_v5 = vrot.slane %v1427_v61, 5  ;;  %v1416_v8 = vor.u32 %v1415_v2, %v1412_v1  ;;  %v1435_v10 = vrot.slane %v1433_v62, 5  ;;  %v1438_v20 = vshrl.u32 %v1921_v11, 16  ;;  %v1928_v39 = vld [vmem:[%s2240_s27 + $0x44] sm:$0x1] }
  0x42   : > { %2069 = vmatmul.mubr.msk.bf16.gmra.mxu1 %vm244_vm1, %v1874_v46  ;;  %v1394_v7 = vsel %vm2282_vm4, %v1389_v0, %v1393_v48  ;;  %v1408_v12 = vsel %vm2282_vm4, %v1403_v3, %v1407_v53  ;;  %v1441_v21 = vshll.u32 %v1921_v11, 16  ;;  %v1447_v24 = vshll.u32 %v1922_v15, 16  ;;  %v2146_v47 = vld [vmem:[%s2240_s27 + $0x80] ss:$8 sps:$4 sm:$0xff]  }
  0x43   : > { %2084 = vmatprep.mubr.msk.bf16.mxu1 %vm244_vm1, %v2143_v32  ;;  %v1430_v13 = vor.u32 %v1429_v5, %v1426_v4  ;;  %v1930_v18 = vcombine.low %v1394_v7, %v1408_v12  ;;  %v1417_v19 = vrot.slane %v1416_v8, 4  ;;  %v1440_v30 = vrot.slane %v1438_v20, 4 }
  0x44   : > { %2075 = vmatmul.mubr.msk.bf16.vlgmr.msra.gmra.mxu0 %vm244_vm1, %v2140_v16  ;;  %v1923_v16 = vld [vmem:[%s2240_s27 + $0x30] sm:$0xf]  ;;  %v1443_v31 = vrot.slane %v1441_v21, 5  ;;  %v1461_v32 = vshll.u32 %v1924_v17, 16  ;;  %v1449_v35 = vrot.slane %v1447_v24, 5  ;;  %v1466_v42 = vshrl.u32 %v1925_v22, 16 }
  0x45   : > { %2093 = vmatpush3.bf16.msra.mxu0 %v1520_v25  ;;  %2078 = vmatprep.mubr.msk.bf16.mxu0 %vm244_vm1, %v2141_v29  ;;  %v1431_v23 = vrot.slane %v1430_v13, 4  ;;  %v1452_v25 = vshrl.u32 %v1923_v16, 16  ;;  %v1455_v26 = vshll.u32 %v1923_v16, 16  ;;  %v1422_v29 = vsel %vm2282_vm4, %v1417_v19, %v1421_v9 }
  0x46   : > { %v1444_v40 = vor.u32 %v1443_v31, %v1440_v30  ;;  %v1463_v41 = vrot.slane %v1461_v32, 5  ;;  %v1469_v14 = vshll.u32 %v1925_v22, 16  ;;  %v1475_v45 = vshll.u32 %v1926_v28, 16 }
  0x47   : > { %v1436_v34 = vsel %vm2282_vm4, %v1431_v23, %v1435_v10  ;;  %v1454_v36 = vrot.slane %v1452_v25, 4  ;;  %v1457_v37 = vrot.slane %v1455_v26, 5  ;;  %v1480_v46 = vshrl.u32 %v1927_v33, 16 }
  0x48   : > { %v1931_v27 = vcombine.low %v1422_v29, %v1436_v34  ;;  %v1445_v48 = vrot.slane %v1444_v40, 4  ;;  %v1468_v49 = vrot.slane %v1466_v42, 4  ;;  %v1483_v50 = vshll.u32 %v1927_v33, 16 }
  0x49   : > { %v1458_v44 = vor.u32 %v1457_v37, %v1454_v36  ;;  %v1471_v53 = vrot.slane %v1469_v14, 5  ;;  %v1482_v54 = vrot.slane %v1480_v46, 4  ;;  %v1477_v58 = vrot.slane %v1475_v45, 5 }
  0x4a   : > { %2085 = vmatmul.mubr.msk.bf16.vlgmr.msra.gmra.mxu1 %vm244_vm1, %v2144_v63  ;;  %v1450_v38 = vsel %vm2282_vm4, %v1445_v48, %v1449_v35  ;;  %v1485_v55 = vrot.slane %v1483_v50, 5  ;;  %vm1713_vm5 = vcmask 125952  }
  0x4b   : > { %2088 = vmatprep.mubr.msk.bf16.mxu1 %vm244_vm1, %v2145_v6  ;;  %v1459_v52 = vrot.slane %v1458_v44, 4  ;;  %v1472_v57 = vor.u32 %v1471_v53, %v1468_v49 }
  0x4c   : > { %2079 = vmatmul.mubr.msk.bf16.gmra.mxu0 %vm244_vm1, %v2142_v51  ;;  %v1489_v51 = vshll.u32 %v1928_v39, 16  ;;  %v1486_v60 = vor.u32 %v1485_v55, %v1482_v54 }
  0x4d   : > { %2094 = vmatprep.mubr.msk.bf16.mxu0 %vm244_vm1, %v1930_v18  ;;  %v1464_v56 = vsel %vm2282_vm4, %v1459_v52, %v1463_v41  ;;  %v1473_v62 = vrot.slane %v1472_v57, 4 }
  0x4e   : > { %v1932_v59 = vcombine.low %v1450_v38, %v1464_v56  ;;  %v1491_v61 = vrot.slane %v1489_v51, 5  ;;  %v1487_v63 = vrot.slane %v1486_v60, 4 }
  0x4f   : > { %v1478_v0 = vsel %vm2282_vm4, %v1473_v62, %v1477_v58 }
  0x50   : > { %v1492_v1 = vsel %vm2282_vm4, %v1487_v63, %v1491_v61 }
  0x51   : > { %v1933_v2 = vcombine.low %v1478_v0, %v1492_v1 }
  0x52   : > { %2089 = vmatmul.mubr.msk.bf16.gmra.mxu1 %vm244_vm1, %v2146_v47 }
  0x54   : > { %2095 = vmatmul.mubr.msk.bf16.vlgmr.msra.gmra.mxu0 %vm244_vm1, %v1931_v27 }
  0x55   : > { %2098 = vmatprep.mubr.msk.bf16.mxu0 %vm244_vm1, %v1932_v59 }
  0x5c   : > { %2099 = vmatmul.mubr.msk.bf16.gmra.mxu0 %vm244_vm1, %v1933_v2 }
  0xd1   : > { %v2016_v5 = vpop.f32.mrf.mxu0 }
  0xd2   : > { %v2020_v3 = vpop.f32.mrf.mxu1 }
  0xd3   : > { %v295_v8 = vpop.f32.mrf.mxu0 }
  0xd4   : > { %v311_v4 = vpop.f32.mrf.mxu1 }
  0xd5   : > { %v2017_v11 = vpop.f32.mrf.mxu0 }
  0xd6   : > { %v2447_v6 = vpop.f32.mrf.mxu1 }
  0xd7   : > { %v298_v15 = vpop.f32.mrf.mxu0 }
  0xd8   : > { %v2449_v7 = vpop.f32.mrf.mxu1 }
  0xda   : > { %v2026_v9 = vpop.f32.mrf.mxu1 }
  0xdb   : > { %v404_v14 = vadd.f32 %v2026_v9, %v2016_v5 }
  0xdc   : > { %v395_v10 = vpop.f32.mrf.mxu1 }
  0xdd   : > { %v396_v47 = vadd.f32 %v395_v10, %v295_v8 }
  0xde   : > { %v2027_v12 = vpop.f32.mrf.mxu1 }
  0xdf   : > { %v407_v50 = vadd.f32 %v2027_v12, %v2017_v11 }
  0xe0   : > { %v398_v13 = vpop.f32.mrf.mxu1 }
  0xe1   : > { %v399_v54 = vadd.f32 %v398_v13, %v298_v15 }
  0xe2   : > { %v2030_v16 = vpop.f32.mrf.mxu1  ;;  %v2036_v43 = vpop.f32.mrf.mxu0 }
  0xe3   : > { %v653_v49 = vadd.f32 %v2036_v43, %v404_v14  ;;  %v420_v59 = vadd.f32 %v2030_v16, %v2020_v3 }
  0xe4   : > { %v411_v17 = vpop.f32.mrf.mxu1  ;;  %v620_v18 = vpop.f32.mrf.mxu0 }
  0xe5   : > { %v651_v53 = vadd.f32 %v620_v18, %v396_v47  ;;  %v412_v1 = vadd.f32 %v411_v17, %v311_v4 }
  0xe6   : > { %v2031_v19 = vpop.f32.mrf.mxu1  ;;  %v2037_v20 = vpop.f32.mrf.mxu0 }
  0xe7   : > { %v654_v56 = vadd.f32 %v2037_v20, %v407_v50  ;;  %v423_v12 = vadd.f32 %v2031_v19, %v2447_v6 }
  0xe8   : > { %v414_v21 = vpop.f32.mrf.mxu1  ;;  %v623_v22 = vpop.f32.mrf.mxu0 }
  0xe9   : > { %v652_v61 = vadd.f32 %v623_v22, %v399_v54  ;;  %v415_v3 = vadd.f32 %v414_v21, %v2449_v7 }
  0xea   : > { %v2046_v23 = vpop.f32.mrf.mxu1 }
  0xeb   : > { %v772_v38 = vadd.f32 %v2046_v23, %v653_v49 }
  0xec   : > { %v739_v24 = vpop.f32.mrf.mxu1  ;;  %v2040_v25 = vpop.f32.mrf.mxu0 }
  0xed   : > { %v770_v57 = vadd.f32 %v739_v24, %v651_v53  ;;  %v657_v11 = vadd.f32 %v2040_v25, %v420_v59 }
  0xee   : > { %v2047_v26 = vpop.f32.mrf.mxu1  ;;  %v636_v28 = vpop.f32.mrf.mxu0 }
  0xef   : > { %v773_v63 = vadd.f32 %v2047_v26, %v654_v56  ;;  %v655_v20 = vadd.f32 %v636_v28, %v412_v1 }
  0xf0   : > { %v742_v29 = vpop.f32.mrf.mxu1  ;;  %v2041_v30 = vpop.f32.mrf.mxu0 }
  0xf1   : > { %v771_v8 = vadd.f32 %v742_v29, %v652_v61  ;;  %v658_v26 = vadd.f32 %v2041_v30, %v423_v12  ;;  %v2463_v30 = vld [vmem:[%s2526_s2] ss:$0 sm:$0xff] }
  0xf2   : > { %v2050_v31 = vpop.f32.mrf.mxu1  ;;  %v639_v32 = vpop.f32.mrf.mxu0 }
  0xf3   : > { %v776_v16 = vadd.f32 %v2050_v31, %v657_v11  ;;  %v656_v19 = vadd.f32 %v639_v32, %v415_v3 }
  0xf4   : > { %v755_v33 = vpop.f32.mrf.mxu1  ;;  %v2056_v34 = vpop.f32.mrf.mxu0 }
  0xf5   : > { %v891_v62 = vadd.f32 %v2056_v34, %v772_v38  ;;  %v774_v29 = vadd.f32 %v755_v33, %v655_v20 }
  0xf6   : > { %v2051_v35 = vpop.f32.mrf.mxu1  ;;  %v858_v36 = vpop.f32.mrf.mxu0 }
  0xf7   : > { %v889_v5 = vadd.f32 %v858_v36, %v770_v57 }
  0xf8   : > { %v2057_v37 = vpop.f32.mrf.mxu0  ;;  %v2451_v39 = vpop.f32.mrf.mxu1 }
  0xf9   : > { %v892_v15 = vadd.f32 %v2057_v37, %v773_v63  ;;  %v775_v31 = vadd.f32 %v2451_v39, %v656_v19 }
  0xfa   : > { %v861_v27 = vpop.f32.mrf.mxu0  ;;  %v2066_v41 = vpop.f32.mrf.mxu1 }
  0xfb   : > { %v1121_v9 = vadd.f32 %v2066_v41, %v891_v62  ;;  %v890_v23 = vadd.f32 %v861_v27, %v771_v8 }
  0xfc   : > { %v2060_v40 = vpop.f32.mrf.mxu0  ;;  %v1088_v44 = vpop.f32.mrf.mxu1 }
  0xfd   : > { %v1119_v43 = vadd.f32 %v1088_v44, %v889_v5  ;;  %v895_v37 = vadd.f32 %v2060_v40, %v776_v16  ;;  %v777_v44 = vadd.f32 %v2051_v35, %v658_v26 }
  0xfe   : > { %v874_v42 = vpop.f32.mrf.mxu0  ;;  %v2067_v46 = vpop.f32.mrf.mxu1 }
  0xff   : > { %v1122_v4 = vadd.f32 %v2067_v46, %v892_v15  ;;  %v893_v21 = vadd.f32 %v874_v42, %v774_v29  ;;  %v1939_v42 = vld [vmem:[%s2527_s3] ss:$0 sm:$0xff] }
 0x100   : > { %v2453_v45 = vpop.f32.mrf.mxu0  ;;  %v1091_v51 = vpop.f32.mrf.mxu1 }
 0x101   : > { %v1120_v25 = vadd.f32 %v1091_v51, %v890_v23  ;;  %v896_v35 = vadd.f32 %v2453_v45, %v777_v44 }
 0x102   : > { %v2455_v48 = vpop.f32.mrf.mxu0  ;;  %v2070_v58 = vpop.f32.mrf.mxu1 }
 0x103   : > { %v1125_v27 = vadd.f32 %v2070_v58, %v895_v37  ;;  %v894_v38 = vadd.f32 %v2455_v48, %v775_v31 }
 0x104   : > { %v2076_v52 = vpop.f32.mrf.mxu0  ;;  %v1104_v0 = vpop.f32.mrf.mxu1 }
 0x105   : > { %v1240_v24 = vadd.f32 %v2076_v52, %v1121_v9  ;;  %v1123_v40 = vadd.f32 %v1104_v0, %v893_v21 }
 0x106   : > { %v1207_v55 = vpop.f32.mrf.mxu0  ;;  %v2071_v10 = vpop.f32.mrf.mxu1 }
 0x107   : > { %v1238_v36 = vadd.f32 %v1207_v55, %v1119_v43  ;;  %v1126_v56 = vadd.f32 %v2071_v10, %v896_v35 }
 0x108   : > { %v2077_v60 = vpop.f32.mrf.mxu0  ;;  %v1107_v18 = vpop.f32.mrf.mxu1 }
 0x109   : > { %v1241_v28 = vadd.f32 %v2077_v60, %v1122_v4  ;;  %v1124_v62 = vadd.f32 %v1107_v18, %v894_v38 }
 0x10a   : > { %v1210_v2 = vpop.f32.mrf.mxu0  ;;  %v2086_v17 = vpop.f32.mrf.mxu1 }
 0x10b   : > { %v1359_v41 = vadd.f32 %v2086_v17, %v1240_v24  ;;  %v1239_v33 = vadd.f32 %v1210_v2, %v1120_v25 }
 0x10c   : > { %v2080_v13 = vpop.f32.mrf.mxu0  ;;  %v1326_v6 = vpop.f32.mrf.mxu1 }
 0x10d   : > { %v1357_v47 = vadd.f32 %v1326_v6, %v1238_v36  ;;  %v1244_v55 = vadd.f32 %v2080_v13, %v1125_v27 }
 0x10e   : > { %v1223_v22 = vpop.f32.mrf.mxu0  ;;  %v2087_v7 = vpop.f32.mrf.mxu1 }
 0x10f   : > { %v1360_v50 = vadd.f32 %v2087_v7, %v1241_v28  ;;  %v1242_v61 = vadd.f32 %v1223_v22, %v1123_v40 }
 0x110   : > { %v2081_v34 = vpop.f32.mrf.mxu0  ;;  %v1329_v32 = vpop.f32.mrf.mxu1 }
 0x111   : > { %v1358_v53 = vadd.f32 %v1329_v32, %v1239_v33  ;;  %v1245_v9 = vadd.f32 %v2081_v34, %v1126_v56 }
 0x112   : > { %v1226_v14 = vpop.f32.mrf.mxu0  ;;  %v2090_v54 = vpop.f32.mrf.mxu1 }
 0x113   : > { %v1363_v0 = vadd.f32 %v2090_v54, %v1244_v55  ;;  %v1243_v43 = vadd.f32 %v1226_v14, %v1124_v62 }
 0x114   : > { %v2096_v46 = vpop.f32.mrf.mxu0  ;;  %v1342_v60 = vpop.f32.mrf.mxu1 }
 0x115   : > { %v1589_v49 = vadd.f32 %v2096_v46, %v1359_v41  ;;  %v1361_v10 = vadd.f32 %v1342_v60, %v1242_v61 }
 0x116   : > { %v1556_v51 = vpop.f32.mrf.mxu0  ;;  %v2091_v8 = vpop.f32.mrf.mxu1 }
 0x117   : > { %v1604_v39 = vmul.f32 %v2463_v30, %v1589_v49  ;;  %v1587_v52 = vadd.f32 %v1556_v51, %v1357_v47  ;;  %v1364_v20 = vadd.f32 %v2091_v8, %v1245_v9 }
 0x118   : > { %v2097_v57 = vpop.f32.mrf.mxu0  ;;  %v1345_v15 = vpop.f32.mrf.mxu1 }
 0x119   : > { %v2471_v58 = vadd.f32 %v1939_v42, %v1604_v39  ;;  %v1602_v45 = vmul.f32 %v2463_v30, %v1587_v52  ;;  %v1590_v59 = vadd.f32 %v2097_v57, %v1360_v50  ;;  %v1362_v24 = vadd.f32 %v1345_v15, %v1243_v43 }
 0x11a   : > { %v1559_v63 = vpop.f32.mrf.mxu0 }
 0x11b   : > { %v1942_v1 = vmul.f32 -1.442695, %v2471_v58  ;;  %v2475_v2 = vadd.f32 %v1939_v42, %v1602_v45  ;;  %v1605_v5 = vmul.f32 %v2463_v30, %v1590_v59  ;;  %v1588_v48 = vadd.f32 %v1559_v63, %v1358_v53 }
 0x11c   : > { %v2100_v18 = vpop.f32.mrf.mxu0 }
 0x11d   : > { %2147 = vpow2.f32 %v1942_v1  ;;  %v1940_v11 = vmul.f32 -1.442695, %v2475_v2  ;;  %v2479_v12 = vadd.f32 %v1939_v42, %v1605_v5  ;;  %v1603_v13 = vmul.f32 %v2463_v30, %v1588_v48 }
 0x11e   : > { %v1593_v22 = vadd.f32 %v2100_v18, %v1363_v0  ;;  %v1572_v23 = vpop.f32.mrf.mxu0 }
 0x11f   : > { %2149 = vpow2.f32 %v1940_v11  ;;  %v1943_v3 = vmul.f32 -1.442695, %v2479_v12  ;;  %v2483_v16 = vadd.f32 %v1939_v42, %v1603_v13  ;;  %v1591_v26 = vadd.f32 %v1572_v23, %v1361_v10 }
 0x120   : > { %v1608_v17 = vmul.f32 %v2463_v30, %v1593_v22  ;;  %v2101_v29 = vpop.f32.mrf.mxu0 }
 0x121   : > { %2151 = vpow2.f32 %v1943_v3  ;;  %v1941_v4 = vmul.f32 -1.442695, %v2483_v16  ;;  %v1606_v36 = vmul.f32 %v2463_v30, %v1591_v26  ;;  %v1594_v25 = vadd.f32 %v2101_v29, %v1364_v20 }
 0x122   : > { %v2487_v34 = vadd.f32 %v1939_v42, %v1608_v17  ;;  %v1575_v41 = vpop.f32.mrf.mxu0 }
 0x123   : > { %2153 = vpow2.f32 %v1941_v4  ;;  %v1621_v19 = vadd.f32 %v1939_v42, %v1606_v36  ;;  %v1609_v37 = vmul.f32 %v2463_v30, %v1594_v25  ;;  %v1592_v44 = vadd.f32 %v1575_v41, %v1362_v24 }
 0x124   : > { %v1946_v6 = vmul.f32 -1.442695, %v2487_v34 }
 0x125   : > { %v1944_v14 = vmul.f32 -1.442695, %v1621_v19  ;;  %v1624_v28 = vadd.f32 %v1939_v42, %v1609_v37  ;;  %v1607_v47 = vmul.f32 %v2463_v30, %v1592_v44 }
 0x126   : > { %2155 = vpow2.f32 %v1946_v6 }
 0x127   : > { %2157 = vpow2.f32 %v1944_v14  ;;  %v1947_v7 = vmul.f32 -1.442695, %v1624_v28  ;;  %v1622_v21 = vadd.f32 %v1939_v42, %v1607_v47 }
 0x129   : > { %2159 = vpow2.f32 %v1947_v7  ;;  %v1945_v46 = vmul.f32 -1.442695, %v1622_v21 }
 0x12a   : > { %v2148_v31 = vpop.eup %2147 }
 0x12b   : > { %v1651_v27 = vadd.f32 1.0, %v2148_v31 }
 0x12c   : > { %v2150_v33 = vpop.eup %2149 }
 0x12d   : > { %2161 = vrcp.f32 %v1651_v27  ;;  %v1649_v49 = vadd.f32 1.0, %v2150_v33 }
 0x12e   : > { %v2152_v50 = vpop.eup %2151  ;;  %2163 = vpow2.f32 %v1945_v46 }
 0x12f   : > { %2165 = vrcp.f32 %v1649_v49  ;;  %v1652_v32 = vadd.f32 1.0, %v2152_v50 }
 0x130   : > { %v2154_v35 = vpop.eup %2153 }
 0x131   : > { %2167 = vrcp.f32 %v1652_v32  ;;  %v1650_v30 = vadd.f32 1.0, %v2154_v35 }
 0x133   : > { %2169 = vrcp.f32 %v1650_v30  ;;  %v2156_v40 = vpop.eup %2155 }
 0x134   : > { %v1655_v42 = vadd.f32 1.0, %v2156_v40  ;;  %v2158_v51 = vpop.eup %2157 }
 0x135   : > { %v1653_v39 = vadd.f32 1.0, %v2158_v51 }
 0x136   : > { %2171 = vrcp.f32 %v1655_v42  ;;  %v2160_v52 = vpop.eup %2159 }
 0x137   : > { %2173 = vrcp.f32 %v1653_v39  ;;  %v1656_v53 = vadd.f32 1.0, %v2160_v52 }
 0x139   : > { %2175 = vrcp.f32 %v1656_v53 }
 0x13a   : > { %v2162_v54 = vpop.eup %2161 }
 0x13b   : > { %v2164_v38 = vpop.eup %2163  ;;  %v1675_v55 = vmul.f32 %v2162_v54, %v2471_v58 }
 0x13c   : > { %v2166_v56 = vpop.eup %2165  ;;  %v1654_v57 = vadd.f32 1.0, %v2164_v38 }
 0x13d   : > { %v1961_v45 = vpack.c.bf16 %v1675_v55, %v1675_v55  ;;  %v1673_v59 = vmul.f32 %v2166_v56, %v2475_v2 }
 0x13e   : > { %v2168_v60 = vpop.eup %2167  ;;  %2177 = vrcp.f32 %v1654_v57 }
 0x13f   : > { %1716 = vst.msk [vmem:[%s2499_s23 + $0x8] sm:$0xf] %vm1713_vm5, %v1961_v45  ;;  %v1959_v58 = vpack.c.bf16 %v1673_v59, %v1673_v59  ;;  %v1676_v61 = vmul.f32 %v2168_v60, %v2479_v12 }
 0x140   : > { %v2170_v62 = vpop.eup %2169 }
 0x141   : > { %1714 = vst.msk [vmem:[%s2499_s23] sm:$0xf] %vm1713_vm5, %v1959_v58  ;;  %v1962_v63 = vpack.c.bf16 %v1676_v61, %v1676_v61  ;;  %v1674_v0 = vmul.f32 %v2170_v62, %v2483_v16 }
 0x143   : > { %1717 = vst.msk [vmem:[%s2499_s23 + $0xc] sm:$0xf] %vm1713_vm5, %v1962_v63  ;;  %v1960_v1 = vpack.c.bf16 %v1674_v0, %v1674_v0  ;;  %v2172_v2 = vpop.eup %2171 }
 0x144   : > { %v1679_v5 = vmul.f32 %v2172_v2, %v2487_v34  ;;  %v2174_v48 = vpop.eup %2173 }
 0x145   : > { %1715 = vst.msk [vmem:[%s2499_s23 + $0x4] sm:$0xf] %vm1713_vm5, %v1960_v1  ;;  %v1677_v9 = vmul.f32 %v2174_v48, %v1621_v19 }
 0x146   : > { %v1965_v8 = vpack.c.bf16 %v1679_v5, %v1679_v5  ;;  %v2176_v10 = vpop.eup %2175 }
 0x147   : > { %v1963_v11 = vpack.c.bf16 %v1677_v9, %v1677_v9  ;;  %v1680_v12 = vmul.f32 %v2176_v10, %v1624_v28 }
 0x148   : > { %1720 = vst.msk [vmem:[%s2499_s23 + $0x18] sm:$0xf] %vm1713_vm5, %v1965_v8 }
 0x149   : > { %1718 = vst.msk [vmem:[%s2499_s23 + $0x10] sm:$0xf] %vm1713_vm5, %v1963_v11  ;;  %v1966_v15 = vpack.c.bf16 %v1680_v12, %v1680_v12 }
 0x14b   : > { %v2178_v13 = vpop.eup %2177  ;;  %1721 = vst.msk [vmem:[%s2499_s23 + $0x1c] sm:$0xf] %vm1713_vm5, %v1966_v15 }
 0x14c   : > { %v1678_v43 = vmul.f32 %v2178_v13, %v1622_v21 }
 0x14e   : > { %v1964_v18 = vpack.c.bf16 %v1678_v43, %v1678_v43 }
 0x150   : > { %1719 = vst.msk [vmem:[%s2499_s23 + $0x14] sm:$0xf] %vm1713_vm5, %v1964_v18 }
 0x151 PF: > { %s14_s15 = sadd.s32 1, %s2185_s15  }
 0x152   : > { %p11_p5 = scmp.ge.s32.totalorder %s14_s15, 4  }
 0x154   :  { %13 = sbr.rel (!%p11_p5) target bundleno = 1 (0x1), region = 79 }

</bundles_post_ra>
